<compile_context>
chip_gen: v7x
topology: tpu7x:2x2x1
jax: 0.10.0
libtpu: 0.0.40
codegen_flags: <defaults>
</compile_context>

<pallas_src>
import math

import jax
import jax.numpy as jnp
from jax import lax
from jax.experimental import pallas as pl
from jax.experimental.pallas import tpu as pltpu


def _bilinear_kernel(x_ref, w1b_ref, w2t_ref, o_ref):
    # x_ref:   (TB, in1, in2)       block of the batch
    # w1b_ref: (TB, out1, in1)      W1 pre-broadcast over the block (resident)
    # w2t_ref: (in2, out2_pad)      resident, already transposed & lane-padded
    # o_ref:   (TB, out1, out2_pad)
    tb, in1, in2 = x_ref.shape
    out2p = w2t_ref.shape[1]

    # --- mode-2 product, fused over the whole batch block ------------------
    # (TB, in1, in2) -> (TB*in1, in2) leaves the lane dim untouched; one large
    # MXU matmul replaces TB tiny ones.
    xf = x_ref[...].reshape(tb * in1, in2)
    y = jnp.dot(xf, w2t_ref[...], preferred_element_type=jnp.float32)
    y = y.reshape(tb, in1, out2p)                      # (TB, in1, out2_pad) f32

    # --- mode-1 product: out[b] = W1 @ y[b] ---------------------------------
    # Canonical batched dot_general; the batched LHS is loaded straight from
    # the resident pre-broadcast weight (no per-step broadcast materialized).
    out = lax.dot_general(
        w1b_ref[...].astype(jnp.float32), y,
        dimension_numbers=(((2,), (1,)), ((0,), (0,))),
        preferred_element_type=jnp.float32,
    )                                                   # (TB, out1, out2_pad)

    o_ref[...] = out.astype(o_ref.dtype)


def _choose_block_b(B, in1, in2, out1, out2_pad, x_itemsize, w_itemsize,
                    budget_bytes=10 * 1024 * 1024):
    """Pick a batch block that keeps the pipelined VMEM footprint bounded."""
    per_b = 2 * in1 * in2 * x_itemsize          # x block, double-buffered
    per_b += 2 * out1 * out2_pad * x_itemsize   # out block, double-buffered
    per_b += 2 * out1 * in1 * w_itemsize        # broadcast W1 block, double-buffered
    per_b += in1 * out2_pad * 4                 # f32 intermediate y
    per_b += out1 * out2_pad * 4                # f32 result before cast
    tb = max(1, budget_bytes // per_b)
    tb = int(min(tb, B, 512))
    if tb >= 8:
        tb = (tb // 8) * 8                      # keep TB*in1 sublane/MXU friendly
    return max(1, tb)


def bilinear_layer(x, w1, w2, *, block_b=None, pad_lanes=True):
    """outputs[b] = W1 @ x[b] @ W2.T  (Pallas TPU kernel)."""
    B, in1, in2 = x.shape
    out1, in1_w = w1.shape
    out2, in2_w = w2.shape
    assert in1 == in1_w and in2 == in2_w, "weight shapes do not match input"

    # Hoist the W2 transpose out of the kernel (constant-weight layout plumbing).
    w2t = w2.T                                            # (in2, out2)

    # Lane-dense output / MXU-aligned N: zero-pad out2 up to a multiple of 128.
    out2_pad = out2
    if pad_lanes and out2 % 128 != 0:
        out2_pad = ((out2 + 127) // 128) * 128
        w2t = jnp.pad(w2t, ((0, 0), (0, out2_pad - out2)))

    x_item = jnp.dtype(x.dtype).itemsize
    w_item = jnp.dtype(w1.dtype).itemsize
    if block_b is None:
        block_b = _choose_block_b(B, in1, in2, out1, out2_pad, x_item, w_item)
    block_b = max(1, min(int(block_b), B))

    # Broadcast W1 over the batch block ONCE outside the kernel; with a
    # constant block index it stays resident in VMEM across all grid steps.
    w1b = jnp.broadcast_to(w1[None], (block_b, out1, in1))

    grid = (pl.cdiv(B, block_b),)   # partial last block is handled by Pallas
                                    # (OOB rows never mix with valid rows here)

    flops = 2 * B * in1 * out2_pad * (in2 + out1)
    bytes_accessed = (
        B * in1 * in2 * x_item
        + block_b * out1 * in1 * w_item
        + in2 * out2_pad * w_item
        + B * out1 * out2_pad * x_item
    )

    out_padded = pl.pallas_call(
        _bilinear_kernel,
        out_shape=jax.ShapeDtypeStruct((B, out1, out2_pad), x.dtype),
        grid_spec=pltpu.PrefetchScalarGridSpec(
            num_scalar_prefetch=0,
            grid=grid,
            in_specs=[
                # a block of the batch per grid step; last two dims = full extents
                pl.BlockSpec((block_b, in1, in2), lambda nb: (nb, 0, 0)),
                # small weights: constant block index -> stay resident in VMEM
                pl.BlockSpec((block_b, out1, in1), lambda nb: (0, 0, 0)),
                pl.BlockSpec((in2, out2_pad), lambda nb: (0, 0)),
            ],
            out_specs=pl.BlockSpec((block_b, out1, out2_pad), lambda nb: (nb, 0, 0)),
        ),
        compiler_params=pltpu.CompilerParams(
            dimension_semantics=("parallel",),      # batch axis shardable across TCs
            vmem_limit_bytes=32 * 1024 * 1024,      # safe on v5e/v6e/v7x scoped VMEM
        ),
        cost_estimate=pl.CostEstimate(
            flops=int(flops), transcendentals=0, bytes_accessed=int(bytes_accessed)
        ),
    )(x, w1b, w2t)

    if out2_pad != out2:
        out_padded = out_padded[:, :, :out2]
    return out_padded


def xavier_uniform(key, shape, dtype=jnp.float32):
    # Matches torch.nn.init.xavier_uniform_ (gain=1): U(-a, a), a = sqrt(6/(fan_in+fan_out))
    fan_out, fan_in = shape
    a = math.sqrt(6.0 / (fan_in + fan_out))
    return jax.random.uniform(key, shape, dtype=dtype, minval=-a, maxval=a)


def reference(x, w1, w2):
    # Pure-JAX reference of the PyTorch forward.
    y1 = jnp.einsum("bij,oj->bio", x, w2)     # mode-2: x @ W2.T
    out = jnp.einsum("oi,bij->boj", w1, y1)   # mode-1: W1 @ y1
    return out


if __name__ == "__main__":
    key = jax.random.PRNGKey(0)
    k_x, k_w1, k_w2 = jax.random.split(key, 3)

    B, in1, in2 = 8, 16, 32      # input_shape  = (in1, in2)
    out1, out2 = 8, 24           # output_shape = (out1, out2)

    x = jax.random.normal(k_x, (B, in1, in2), dtype=jnp.float32)
    w1 = xavier_uniform(k_w1, (out1, in1))   # W1: (out1, in1)
    w2 = xavier_uniform(k_w2, (out2, in2))   # W2: (out2, in2)

    # block_b=4 -> 2 grid steps, exercising the batch-blocked pipeline.
    out = bilinear_layer(x, w1, w2, block_b=4)
    out = jax.block_until_ready(out)

    ref = reference(x, w1, w2)
    assert out.shape == (B, out1, out2), out.shape
    assert jnp.allclose(out, ref, atol=1e-5, rtol=1e-5), "mismatch vs reference"

    # Also exercise the auto-chosen block size path.
    out2_auto = jax.block_until_ready(bilinear_layer(x, w1, w2))
    assert jnp.allclose(out2_auto, ref, atol=1e-5, rtol=1e-5), "mismatch (auto block)"

    print("KERNEL_OK")
</pallas_src>

<mosaic_0001>
module attributes {stable_mosaic.version = 11 : i64} {
  func.func @_bilinear_kernel(%arg0: i32, %arg1: memref<4x16x32xf32, #tpu.memory_space<vmem>>, %arg2: memref<4x8x16xf32, #tpu.memory_space<vmem>>, %arg3: memref<32x128xf32, #tpu.memory_space<vmem>>, %arg4: memref<4x8x128xf32, #tpu.memory_space<vmem>>) attributes {dimension_semantics = [#tpu.dimension_semantics<parallel>], iteration_bounds = array<i64: 2>, scalar_prefetch = 0 : i64, scratch_operands = 0 : i64, tpu.core_type = #tpu.core_type<tc>, window_params = [{transform_indices = @transform_0, window_bounds = array<i64: 4, 16, 32>}, {pipeline_mode = #tpu.pipeline_mode<synchronous>, transform_indices = @transform_1, window_bounds = array<i64: 4, 8, 16>}, {pipeline_mode = #tpu.pipeline_mode<synchronous>, transform_indices = @transform_2, window_bounds = array<i64: 32, 128>}, {transform_indices = @transform_3, window_bounds = array<i64: 4, 8, 128>}]} {
    %c0 = arith.constant 0 : index
    %c0_0 = arith.constant 0 : index
    %c0_1 = arith.constant 0 : index
    %0 = vector.load %arg1[%c0, %c0_0, %c0_1] : memref<4x16x32xf32, #tpu.memory_space<vmem>>, vector<4x16x32xf32>
    %1 = vector.shape_cast %0 : vector<4x16x32xf32> to vector<64x32xf32>
    %c0_2 = arith.constant 0 : index
    %c0_3 = arith.constant 0 : index
    %2 = vector.load %arg3[%c0_2, %c0_3] : memref<32x128xf32, #tpu.memory_space<vmem>>, vector<32x128xf32>
    %cst = arith.constant dense<0.000000e+00> : vector<64x128xf32>
    %3 = tpu.matmul %1, %2, %cst {dimension_numbers = #tpu.dot_dimension_numbers<[1], [0], [0], [1], [0, 0, 1, 1], [], []>} : vector<64x32xf32>, vector<32x128xf32>, vector<64x128xf32> -> vector<64x128xf32>
    %4 = vector.shape_cast %3 : vector<64x128xf32> to vector<4x16x128xf32>
    %c0_4 = arith.constant 0 : index
    %c0_5 = arith.constant 0 : index
    %c0_6 = arith.constant 0 : index
    %5 = vector.load %arg2[%c0_4, %c0_5, %c0_6] : memref<4x8x16xf32, #tpu.memory_space<vmem>>, vector<4x8x16xf32>
    %cst_7 = arith.constant dense<0.000000e+00> : vector<4x8x128xf32>
    %6 = tpu.matmul %5, %4, %cst_7 {dimension_numbers = #tpu.dot_dimension_numbers<[2], [1], [1], [2], [0, 0, 0, 1, 1, 2], [0], [0]>} : vector<4x8x16xf32>, vector<4x16x128xf32>, vector<4x8x128xf32> -> vector<4x8x128xf32>
    %c0_8 = arith.constant 0 : index
    %c0_9 = arith.constant 0 : index
    %c0_10 = arith.constant 0 : index
    %7 = vector.load %arg4[%c0_8, %c0_9, %c0_10] : memref<4x8x128xf32, #tpu.memory_space<vmem>>, vector<4x8x128xf32>
    tpu.vector_store %arg4[%c0_8, %c0_9, %c0_10], %6 {strides = array<i32>} : memref<4x8x128xf32, #tpu.memory_space<vmem>>, vector<4x8x128xf32>,
    return
  }
  func.func @transform_0(%arg0: i32) -> (i32, i32, i32) {
    %c0_i32 = arith.constant 0 : i32
    %c0_i32_0 = arith.constant 0 : i32
    %c0_i32_1 = arith.constant 0 : i32
    return %arg0, %c0_i32, %c0_i32_0 : i32, i32, i32
  }
  func.func @transform_1(%arg0: i32) -> (i32, i32, i32) {
    %c0_i32 = arith.constant 0 : i32
    %c0_i32_0 = arith.constant 0 : i32
    %c0_i32_1 = arith.constant 0 : i32
    %c0_i32_2 = arith.constant 0 : i32
    return %c0_i32, %c0_i32_0, %c0_i32_1 : i32, i32, i32
  }
  func.func @transform_2(%arg0: i32) -> (i32, i32) {
    %c0_i32 = arith.constant 0 : i32
    %c0_i32_0 = arith.constant 0 : i32
    %c0_i32_1 = arith.constant 0 : i32
    return %c0_i32, %c0_i32_0 : i32, i32
  }
  func.func @transform_3(%arg0: i32) -> (i32, i32, i32) {
    %c0_i32 = arith.constant 0 : i32
    %c0_i32_0 = arith.constant 0 : i32
    %c0_i32_1 = arith.constant 0 : i32
    return %arg0, %c0_i32, %c0_i32_0 : i32, i32, i32
  }
}

</mosaic_0001>

<bundles_post_ra>
// kernel: tpu_custom_call.1
= control target key start
LH: loop header
LB: loop body
LE: loop exit
PB: predicated region body
PF: predicated region fallthrough
CT: control target
= control target key end

     0   :  { %8 = vsyncpa [#allocation3], 0  ;;  %s1419_s0 = inlined_call_operand.hbm [shape: f32[8,16,32], index: 0, kind: input, shape index: {}]   ;;  %s1420_s1 = inlined_call_operand.hbm [shape: f32[4,8,16], index: 1, kind: input, shape index: {}]   ;;  %s1421_s2 = inlined_call_operand.hbm [shape: f32[32,128], index: 2, kind: input, shape index: {}]   ;;  %s1422_s3 = inlined_call_operand.hbm [shape: f32[8,8,128], index: 3, kind: output, shape index: {}]  }
   0x1   :  { %10 = vsyncpa [#allocation3 + $0x1], 0 }
   0x2   :  { %11 = vsyncpa [#allocation6], 0 }
   0x3   :  { %12 = vsyncpa [#allocation4], 0 }
   0x4   :  { %14 = vsyncpa [#allocation4 + $0x1], 0  ;;  %s1159_s12 = smov 0   ;;  %s1161_s13 = smov 0  }
   0x5   :  { %s1163_s14 = smov 0   ;;  %s1165_s15 = smov 0  }
   0x6 LB: > { %s1180_s16 = sadd.s32 4294967295, %s1126_s15   ;;  %s770_s17 = sadd.s32 4294967294, %s1126_s15   ;;  %s1126_s15 = sphi %s1165_s15, %s1442_s15   ;;  %s1122_s14 = sphi %s1163_s14, %s1441_s14   ;;  %s1118_s13 = sphi %s1161_s13, %s1440_s13   ;;  %s1114_s12 = sphi %s1159_s12, %s1439_s12  }
   0x7   : > { %p40_p0 = scmp.ne.s32.totalorder %s1118_s13, %s1114_s12  ;;  %p1423_p1 = scmp.eq.s32.totalorder %s1180_s16, 0 }
   0x8   : > { %p112_p3 = scmp.eq.s32.totalorder %s770_s17, 1  ;;  %p771_p5 = scmp.ge.s32.totalorder %s1126_s15, 1 }
   0x9   : > { %p1189_p4 = por %p1423_p1, %p40_p0  ;;  %p119_p7 = scmp.lt.s32.totalorder %s1126_s15, 3 }
   0xa   : > { %p1194_p6 = por %p112_p3, %p40_p0  ;;  %s1128_s21 = smov [#allocation5]  }
   0xb   : > { %s1426_s18 = scalar_select %p1189_p4, 1, 0 }
   0xc   : > { %s1427_s19 = scalar_select %p1194_p6, 1, 0 }
   0xd   : > { %p1199_p8 = pnand %p771_p5, %p119_p7  ;;  %s131_s22 = sshll.u32 %s1128_s21, 4  ;;  %s1203_s22 = int_to_ptr.vmem [resolvable:$true] %s131_s22 }
   0xe   : > { %s1129_s24 = smov [#allocation7]   ;;  %s970_s28 = scalar_lea.hbm %s1420_s1, 512 }
   0xf   : > { %p908_p9 = pneg %p1199_p8  ;;  %s144_s25 = sshll.u32 %s1129_s24, 4  ;;  %s1214_s25 = int_to_ptr.vmem [resolvable:$true] %s144_s25 }
  0x10   : > { %p971_p12 = scmp.ne.s32.totalorder %s1420_s1, %s970_s28  ;;  %p977_p5 = scmp.lt.u32.totalorder %s970_s28, %s1420_s1 }
  0x11   : > { %p1210_p11 = pnand %p908_p9, %p1423_p1 }
  0x13   : > { %p972_p13 = pneg %p1210_p11 }
  0x15   : > { %p973_p0 = pnand %p972_p13, %p971_p12 }
  0x17   : > { %p974_p3 = pneg %p973_p0 }
  0x19   : > { %p979_p7 = pnand %p977_p5, %p974_p3 }
  0x1b   : > { %982 = shalt.err (!%p979_p7)
}
  0x1c   : > { %s983_s6 = scalar_lea.vmem %s1203_s22, 512  ;;  %p991_p2 = scmp.lt.s32.totalorder %s1203_s22, %s1203_s22 }
  0x1d   : > { %p984_p9 = scmp.ne.s32.totalorder %s1203_s22, %s983_s6  ;;  %p992_p12 = scmp.lt.s32.totalorder %s983_s6, %s983_s6 }
  0x1f   : > { %p986_p10 = pnand %p984_p9, %p972_p13  ;;  %p993_p0 = por %p992_p12, %p991_p2 }
  0x21   : > { %p987_p1 = pneg %p986_p10 }
  0x23   : > { %p994_p6 = pnand %p993_p0, %p987_p1 }
  0x25   : > { %997 = shalt.err (!%p994_p6)
}
  0x26   : > { %s1130_s7 = smov 128   ;;  %s1131_s8 = smov 8  }
  0x27   : > { %911 = dma.hbm_to_vmem [thread:$0]  (!%p1210_p11), %s1420_s1, 512, %s1203_s22, [#allocation6], %s1130_s7, %s1130_s7, %s1131_s8  }
  0x28   : > { %s998_s21 = scalar_lea.hbm %s1421_s2, 512 }
  0x29   : > { %p999_p1 = scmp.ne.s32.totalorder %s1421_s2, %s998_s21  ;;  %p1005_p10 = scmp.lt.u32.totalorder %s998_s21, %s1421_s2 }
  0x2b   : > { %p1001_p2 = pnand %p999_p1, %p972_p13 }
  0x2d   : > { %p1002_p6 = pneg %p1001_p2 }
  0x2f   : > { %p1007_p3 = pnand %p1005_p10, %p1002_p6 }
  0x31   : > { %1010 = shalt.err (!%p1007_p3)
}
  0x32   : > { %s1011_s22 = scalar_lea.vmem %s1214_s25, 512  ;;  %p1019_p12 = scmp.lt.s32.totalorder %s1214_s25, %s1214_s25 }
  0x33   : > { %p1012_p5 = scmp.ne.s32.totalorder %s1214_s25, %s1011_s22  ;;  %p1020_p0 = scmp.lt.s32.totalorder %s1011_s22, %s1011_s22 }
  0x35   : > { %p1014_p7 = pnand %p1012_p5, %p972_p13  ;;  %p1021_p1 = por %p1020_p0, %p1019_p12 }
  0x37   : > { %p1015_p9 = pneg %p1014_p7 }
  0x39   : > { %p1022_p2 = pnand %p1021_p1, %p1015_p9 }
  0x3b   : > { %1025 = shalt.err (!%p1022_p2)
}
  0x3c   : > { %914 = dma.hbm_to_vmem [thread:$0]  (!%p1210_p11), %s1421_s2, 512, %s1214_s25, [#allocation6], %s1130_s7, %s1130_s7, %s1131_s8  }
  0x3d   : > { %s1275_s23 = sadd.s32 1, %s1126_s15   ;;  %s27_s4 = sadd.s32 1, %s1122_s14 }
  0x3e   : > { %s24_s5 = ssub.s32 %s1126_s15, %s1275_s23  ;;  %p34_p13 = scmp.ne.s32.totalorder %s1122_s14, %s1118_s13 }
  0x3f   : > { %p25_p6 = scmp.eq.s32.totalorder %s24_s5, 0  ;;  %p35_p10 = scmp.eq.s32.totalorder %s1126_s15, 0 }
  0x40   : > { %p1430_p3 = scmp.eq.s32.totalorder %s1180_s16, 1  ;;  %p925_p7 = scmp.lt.s32.totalorder %s1126_s15, 2 }
  0x41   : > { %s1291_s9 = scalar_select %p25_p6, %s1122_s14, %s27_s4  }
  0x42   : > { %p1285_p5 = por %p1430_p3, %p34_p13  ;;  %p36_p9 = por %p35_p10, %p34_p13 }
  0x43   : > { %s158_s10 = sand.u32 1, %s1122_s14   ;;  %s802_s25 = sshll.u32 %s1126_s15, 10 }
  0x44   : > { %s1431_s6 = scalar_select %p1285_p5, 1, 0 }
  0x45   : > { %s775_s11 = sshll.u32 %s158_s10, 6  ;;  %s1298_s24 = scalar_lea.hbm %s1419_s0, %s802_s25 }
  0x46   : > { %s162_s26 = scalar_lea.vmem [#allocation2], %s775_s11  ;;  %p1302_p11 = pnand %p925_p7, %p36_p9 }
  0x47   : > { %s170_s27 = sshll.u32 %s162_s26, 4  ;;  %s1306_s22 = scalar_lea.sflag [#allocation3], %s158_s10  ;;  %s1300_s27 = int_to_ptr.vmem [resolvable:$true] %s170_s27 }
  0x48   : > { %s1026_s29 = scalar_lea.hbm %s1298_s24, 1024  ;;  %p1028_p0 = pneg %p1302_p11 }
  0x49   : > { %p1027_p12 = scmp.ne.s32.totalorder %s1298_s24, %s1026_s29  ;;  %s1031_s5 = scalar_lea.hbm %s1419_s0, 2048 }
  0x4a   : > { %p1032_p13 = scmp.lt.u32.totalorder %s1298_s24, %s1419_s0  ;;  %p1033_p6 = scmp.lt.u32.totalorder %s1031_s5, %s1026_s29 }
  0x4b   : > { %p1029_p1 = pnand %p1028_p0, %p1027_p12  ;;  %p1035_p3 = scmp.lt.u32.totalorder %s1026_s29, %s1298_s24 }
  0x4c   : > { %p1034_p10 = por %p1033_p6, %p1032_p13 }
  0x4d   : > { %p1030_p2 = pneg %p1029_p1 }
  0x4e   : > { %p1036_p7 = por %p1035_p3, %p1034_p10 }
  0x50   : > { %p1037_p9 = pnand %p1036_p7, %p1030_p2 }
  0x52   : > { %1040 = shalt.err (!%p1037_p9)
}
  0x53   : > { %s1041_s10 = scalar_lea.vmem %s1300_s27, 1024  ;;  %s1132_s17 = smov [#allocation2]  }
  0x54   : > { %p1042_p12 = scmp.ne.s32.totalorder %s1300_s27, %s1041_s10  ;;  %s1046_s21 = sshll.u32 %s1132_s17, 4  ;;  %s1047_s21 = int_to_ptr.vmem [resolvable:$false] %s1046_s21 }
  0x55   : > { %s1048_s26 = scalar_lea.vmem %s1047_s21, 2048  ;;  %p1049_p4 = scmp.lt.s32.totalorder %s1300_s27, %s1047_s21 }
  0x56   : > { %p1044_p1 = pnand %p1042_p12, %p1028_p0  ;;  %p1050_p13 = scmp.lt.s32.totalorder %s1048_s26, %s1041_s10 }
  0x58   : > { %p1045_p5 = pneg %p1044_p1  ;;  %p1051_p6 = por %p1050_p13, %p1049_p4 }
  0x5a   : > { %p1052_p10 = pnand %p1051_p6, %p1045_p5 }
  0x5c   : > { %1055 = shalt.err (!%p1052_p10)
}
  0x5d   : > { %918 = dma.hbm_to_vmem [thread:$0]  (!%p1302_p11), %s1298_s24, 1024, %s1300_s27, %s1306_s22, %s1130_s7, %s1130_s7, %s1131_s8  }
  0x5e   : > { %182 = sbr.rel (%p1199_p8) target bundleno = 573 (0x23d), region = 32  ;;  %s1340_s29 = sand.u32 (!%p1199_p8), 1, %s1118_s13  }
  0x5f   : > { %s780_s30 = sshll.u32 (!%p1199_p8), %s1340_s29, 6  ;;  %s185_s4 = scalar_lea.sflag (!%p1199_p8), [#allocation3], %s1340_s29 }
  0x60   : > { %s188_s5 = scalar_lea.vmem (!%p1199_p8), [#allocation2], %s780_s30  ;;  %p1433_p4 = scmp.ne.s32.totalorder (!%p1199_p8), %s1426_s18, 0 }
  0x65   : > { %1101 = dma.done.wait (%p1433_p4), %s185_s4, 1024  }
  0x66   : > { %1103 = vsyncadd (%p1433_p4), %s185_s4, 4294966272  ;;  %p1434_p5 = scmp.eq.s32.totalorder %s1180_s16, 0 }
  0x68   : > { %1105 = dma.done.wait (%p1434_p5), [#allocation6], 1024   ;;  %p1435_p11 = pmov %p1434_p5 }
  0x69   : > { %vm233_vm0 = vcmask 261120   ;;  %v229_v0 = vld [vmem:[#allocation7] sm:$0xff]  ;;  %v230_v1 = vld [vmem:[#allocation7 + $0x8] sm:$0xff]  ;;  %v231_v2 = vld [vmem:[#allocation7 + $0x10] sm:$0xff]  ;;  %v1133_v14 = vmov 0.0|0.0   ;;  %vm1134_vm1 = vmmov 0  }
  0x6a   : > { %1107 = vsyncadd (%p1435_p11), [#allocation6], 4294966272  ;;  %v876_v3 = vpack.c.bf16 %v230_v1, %v229_v0  ;;  %v232_v4 = vld [vmem:[#allocation7 + $0x18] sm:$0xff]  ;;  %v221_v5 = vld [vmem:[%s188_s5] sm:$0xff]  ;;  %884 = vmatprep.subr.bf16.mxu1 %v1133_v14  ;;  %v1135_v15 = vmov 0.0   ;;  %vm367_vm2 = vcmask 130048  }
  0x6b   : > { %v880_v6 = vpack.c.bf16 %v232_v4, %v231_v2  ;;  %836 = vmatprep.mubr.msk.f32.mxu0 %vm233_vm0, %v221_v5  ;;  %v222_v7 = vld [vmem:[%s188_s5 + $0x8] sm:$0xff]  ;;  %v223_v8 = vld [vmem:[%s188_s5 + $0x10] sm:$0xff]  ;;  %v224_v9 = vld [vmem:[%s188_s5 + $0x18] sm:$0xff]  ;;  %852 = vmatprep.mubr.msk.f32.mxu1 %vm1134_vm1, %v1135_v15  ;;  %s783_s18 = sshll.u32 %s1340_s29, 5  ;;  %s803_s8 = sshll.u32 %s1180_s16, 9 }
  0x6c   : > { %877 = vmatprep.subr.bf16.mxu0 %v876_v3  ;;  %v225_v10 = vld [vmem:[%s188_s5 + $0x20] sm:$0xff]  ;;  %v226_v11 = vld [vmem:[%s188_s5 + $0x28] sm:$0xff]  ;;  %v227_v12 = vld [vmem:[%s188_s5 + $0x30] sm:$0xff]  ;;  %s218_s20 = scalar_lea.vmem [#allocation8], %s783_s18  ;;  %s1375_s28 = scalar_lea.hbm %s1422_s3, %s803_s8 }
  0x6d   : > { %879 = vmatpush3.bf16.msra.mxu0 %v876_v3  ;;  %v228_v13 = vld [vmem:[%s188_s5 + $0x38] sm:$0xff]  ;;  %v363_v20 = vld [vmem:[#allocation5] sm:$0xff]  ;;  %v364_v24 = vld [vmem:[#allocation5 + $0x8] sm:$0xff]  ;;  %s678_s7 = sshll.u32 %s218_s20, 4  ;;  %s665_s22 = scalar_lea.sflag [#allocation4], %s1340_s29  ;;  %s1370_s7 = int_to_ptr.vmem [resolvable:$true] %s678_s7 }
  0x6e   : > { %881 = vmatprep.subr.bf16.mxu0 %v880_v6  ;;  %v365_v28 = vld [vmem:[#allocation5 + $0x10] sm:$0xff]  ;;  %v366_v31 = vld [vmem:[#allocation5 + $0x18] sm:$0xff]  ;;  %s1056_s11 = scalar_lea.vmem %s1370_s7, 512  ;;  %p1436_p0 = scmp.ne.s32.totalorder %s1431_s6, 0 }
  0x6f   : > { %p1057_p8 = scmp.ne.s32.totalorder %s1370_s7, %s1056_s11  ;;  %s1136_s16 = smov [#allocation8]  }
  0x70   : > { %s1060_s25 = sshll.u32 %s1136_s16, 4  ;;  %s1061_s25 = int_to_ptr.vmem [resolvable:$false] %s1060_s25 }
  0x71   : > { %883 = vmatpush3.bf16.msra.mxu0 %v880_v6  ;;  %p1058_p2 = pnand %p1057_p8, %p1436_p0  ;;  %s1062_s10 = scalar_lea.vmem %s1061_s25, 1024 }
  0x72   : > { %p1063_p7 = scmp.lt.s32.totalorder %s1370_s7, %s1061_s25  ;;  %p1064_p9 = scmp.lt.s32.totalorder %s1062_s10, %s1056_s11 }
  0x73   : > { %p1059_p3 = pneg %p1058_p2 }
  0x74   : > { %837 = vmatmul.mubr.msk.f32.vlgmr.msra.gmra.mrb[0].mxu0 %vm233_vm0, %v222_v7  ;;  %p1065_p12 = por %p1064_p9, %p1063_p7 }
  0x75   : > { %839 = vmatprep.mubr.msk.f32.mxu0 %vm233_vm0, %v223_v8 }
  0x76   : > { %p1066_p1 = pnand %p1065_p12, %p1059_p3 }
  0x78   : > { %840 = vmatmul.mubr.msk.f32.gmra.mrb[2].mxu0 %vm233_vm0, %v224_v9 }
  0x79   : > { %842 = vmatprep.mubr.msk.f32.mxu0 %vm233_vm0, %v225_v10 }
  0x7c   : > { %843 = vmatmul.mubr.msk.f32.gmra.mrb[4].mxu0 %vm233_vm0, %v226_v11 }
  0x7d   : > { %845 = vmatprep.mubr.msk.f32.mxu0 %vm233_vm0, %v227_v12 }
  0x80   : > { %846 = vmatmul.mubr.msk.f32.gmra.mrb[6].mxu0 %vm233_vm0, %v228_v13 }
 0x147   : > { %v838_v16 = vpop.f32.mrb[0].mxu0 }
 0x148   : > { %v324_v17 = vpop.f32.mrb[1].mxu0 }
 0x149   : > { %v885_v18 = vpack.c.bf16 %v838_v16, %v324_v17 }
 0x14b   : > { %v841_v19 = vpop.f32.mrb[2].mxu0  ;;  %886 = vmatpush3.bf16.msra.mxu1 %v885_v18 }
 0x14c   : > { %v334_v21 = vpop.f32.mrb[3].mxu0  ;;  %887 = vmatprep.subr.bf16.mxu1 %v1133_v14 }
 0x14d   : > { %v888_v22 = vpack.c.bf16 %v841_v19, %v334_v21 }
 0x14e   : > { %853 = vmatmul.mubr.msk.f32.vlgmr.msra.gmra.mrb[0].mxu1 %vm367_vm2, %v363_v20 }
 0x14f   : > { %v844_v23 = vpop.f32.mrb[4].mxu0  ;;  %889 = vmatpush3.bf16.msra.mxu1 %v888_v22  ;;  %859 = vmatprep.mubr.msk.f32.mxu1 %vm1134_vm1, %v1135_v15 }
 0x150   : > { %v344_v25 = vpop.f32.mrb[5].mxu0  ;;  %890 = vmatprep.subr.bf16.mxu1 %v1133_v14 }
 0x151   : > { %v891_v26 = vpack.c.bf16 %v844_v23, %v344_v25 }
 0x152   : > { %860 = vmatmul.mubr.msk.f32.vlgmr.msra.gmra.mrb[2].mxu1 %vm367_vm2, %v364_v24 }
 0x153   : > { %v847_v27 = vpop.f32.mrb[6].mxu0  ;;  %892 = vmatpush3.bf16.msra.mxu1 %v891_v26  ;;  %866 = vmatprep.mubr.msk.f32.mxu1 %vm1134_vm1, %v1135_v15 }
 0x154   : > { %v354_v29 = vpop.f32.mrb[7].mxu0  ;;  %893 = vmatprep.subr.bf16.mxu1 %v1133_v14 }
 0x155   : > { %v894_v30 = vpack.c.bf16 %v847_v27, %v354_v29 }
 0x156   : > { %867 = vmatmul.mubr.msk.f32.vlgmr.msra.gmra.mrb[4].mxu1 %vm367_vm2, %v365_v28 }
 0x157   : > { %895 = vmatpush3.bf16.msra.mxu1 %v894_v30  ;;  %873 = vmatprep.mubr.msk.f32.mxu1 %vm1134_vm1, %v1135_v15 }
 0x15a   : > { %874 = vmatmul.mubr.msk.f32.vlgmr.msra.gmra.mrb[6].mxu1 %vm367_vm2, %v366_v31 }
 0x221   : > { %v437_v32 = vpop.f32.mrb[0].mxu1 }
 0x222   : > { %660 = vst [vmem:[%s218_s20] sm:$0xff] %v437_v32  ;;  %v854_v33 = vpop.f32.mrb[1].mxu1 }
 0x225   : > { %v510_v34 = vpop.f32.mrb[2].mxu1 }
 0x226   : > { %661 = vst [vmem:[%s218_s20 + $0x8] sm:$0xff] %v510_v34  ;;  %v861_v35 = vpop.f32.mrb[3].mxu1 }
 0x229   : > { %v583_v36 = vpop.f32.mrb[4].mxu1 }
 0x22a   : > { %662 = vst [vmem:[%s218_s20 + $0x10] sm:$0xff] %v583_v36  ;;  %v868_v37 = vpop.f32.mrb[5].mxu1 }
 0x22d   : > { %v656_v38 = vpop.f32.mrb[6].mxu1 }
 0x22e   : > { %663 = vst [vmem:[%s218_s20 + $0x18] sm:$0xff] %v656_v38  ;;  %v875_v39 = vpop.f32.mrb[7].mxu1 }
 0x22f   : > { %1069 = shalt.err (!%p1066_p1)
}
 0x230   : > { %s1070_s17 = scalar_lea.hbm %s1375_s28, 512  ;;  %s1074_s30 = scalar_lea.hbm %s1422_s3, 1024 }
 0x231   : > { %p1071_p13 = scmp.ne.s32.totalorder %s1375_s28, %s1070_s17  ;;  %p1075_p4 = scmp.lt.u32.totalorder %s1375_s28, %s1422_s3 }
 0x232   : > { %p1076_p5 = scmp.lt.u32.totalorder %s1074_s30, %s1070_s17  ;;  %p1078_p8 = scmp.lt.u32.totalorder %s1070_s17, %s1375_s28 }
 0x233   : > { %p1072_p6 = pnand %p1071_p13, %p1436_p0 }
 0x234   : > { %p1077_p11 = por %p1076_p5, %p1075_p4 }
 0x235   : > { %p1073_p10 = pneg %p1072_p6 }
 0x236   : > { %p1079_p2 = por %p1078_p8, %p1077_p11 }
 0x238   : > { %p1080_p3 = pnand %p1079_p2, %p1073_p10 }
 0x23a   : > { %1083 = shalt.err (!%p1080_p3)
}
 0x23b   : > { %s1137_s18 = smov 128   ;;  %s1138_s20 = smov 8  }
 0x23c   : > { %906 = dma.vmem_to_hbm [thread:$0]  (%p1436_p0), %s1370_s7, 512, %s1375_s28, %s665_s22, %s1137_s18, %s1137_s18, %s1138_s20  }
 0x23d PF: > { %s693_s8 = sand.u32 1, %s1114_s12   ;;  %p1437_p7 = scmp.ne.s32.totalorder %s1427_s19, 0 }
 0x23e   : > { %p1438_p9 = scmp.ge.s32.totalorder %s1126_s15, 2  ;;  %s694_s24 = scalar_lea.sflag [#allocation4], %s693_s8 }
 0x240   : > { %p920_p12 = pnand %p1438_p9, %p1437_p7 }
 0x242   : > { %1109 = dma.done.wait (!%p920_p12), %s694_s24, 512  }
 0x243   : > { %1111 = vsyncadd (!%p920_p12), %s694_s24, 4294966784  ;;  %p17_p1 = scmp.ge.s32.totalorder %s1275_s23, 4   ;;  %s1439_s12 = smov %s1118_s13 }
 0x244   : > { %s1440_s13 = smov %s1122_s14  ;;  %s1441_s14 = smov %s1291_s9 }
 0x245   : > { %s1442_s15 = smov %s1275_s23  ;;  %19 = sbr.rel (!%p17_p1) target bundleno = 6 (0x6), region = 85 }
 0x24c   :  { %699 = vsyncpa [#allocation3], 1 }
 0x24d   :  { %701 = vsyncpa [#allocation3 + $0x1], 1 }
 0x24e   :  { %702 = vsyncpa [#allocation6], 1 }
 0x24f   :  { %703 = vsyncpa [#allocation4], 1 }
 0x250   :  { %705 = vsyncpa [#allocation4 + $0x1], 1 }

</bundles_post_ra>
